<compile_context>
chip_gen: v7x
topology: tpu7x:2x2x1
jax: 0.10.0
libtpu: 0.0.40
codegen_flags: <defaults>
</compile_context>

<pallas_src>
import functools

import jax
import jax.numpy as jnp
from jax.experimental import pallas as pl
from jax.experimental.pallas import tpu as pltpu


def _diag_gaussian_kernel(mu_ref, logvar_ref, eps_ref, z_ref, *, std_fn):
    # Compute the blend in float32 and cast only the final result (avoids
    # double rounding when inputs are bf16).
    mu = mu_ref[...].astype(jnp.float32)
    logvar = logvar_ref[...].astype(jnp.float32)
    eps = eps_ref[...].astype(jnp.float32)

    if std_fn == "exp":
        std = jnp.exp(0.5 * logvar)
    elif std_fn == "softplus":
        std = jax.nn.softplus(logvar)
    else:
        raise ValueError(f"unknown std_fn: {std_fn}")

    z_ref[...] = (mu + std * eps).astype(z_ref.dtype)


def diagonal_gaussian_forward(x, key, latent_size, *, std_fn="exp",
                              training=True, tile_b=2048):
    """Forward pass of DiagonalGaussian: returns (z, (mu, logvar))."""
    B, F = x.shape
    L = latent_size
    assert F == 2 * L, "last dim must be 2 * latent_size"
    # Lane-aligned half-blocks of x require L to be a multiple of 128.
    # TODO(synk): for L % 128 != 0, pre-slice mu/logvar in the wrapper instead.
    assert L % 128 == 0, "latent_size must be a multiple of 128 (lane width)"

    mu = x[:, :L]
    logvar = x[:, L:]

    if not training:
        # Eval mode in PyTorch: reparam() returns mu unchanged.
        return mu, (mu, logvar)

    eps = jax.random.normal(key, (B, L), dtype=jnp.float32)

    tb = min(tile_b, B)
    grid = (pl.cdiv(B, tb),)

    z = pl.pallas_call(
        functools.partial(_diag_gaussian_kernel, std_fn=std_fn),
        out_shape=jax.ShapeDtypeStruct((B, L), x.dtype),
        grid=grid,
        in_specs=[
            pl.BlockSpec((tb, L), lambda i: (i, 0)),  # mu half of x
            pl.BlockSpec((tb, L), lambda i: (i, 1)),  # logvar half of x
            pl.BlockSpec((tb, L), lambda i: (i, 0)),  # eps
        ],
        out_specs=pl.BlockSpec((tb, L), lambda i: (i, 0)),
        compiler_params=pltpu.CompilerParams(
            dimension_semantics=("parallel",),
        ),
    )(x, x, eps)

    return z, (mu, logvar)


if __name__ == "__main__":
    latent_size = 128
    batch = 8

    key = jax.random.PRNGKey(0)
    x_key, noise_key = jax.random.split(key)

    # Deterministic example input: [batch, 2 * latent_size]
    x = jax.random.normal(x_key, (batch, 2 * latent_size), dtype=jnp.float32)

    z, (mu, logvar) = diagonal_gaussian_forward(
        x, noise_key, latent_size, std_fn="exp", training=True)
    jax.block_until_ready((z, mu, logvar))

    # Reference computation (same noise key -> exact comparison).
    mu_ref = x[:, :latent_size]
    logvar_ref = x[:, latent_size:]
    eps_ref = jax.random.normal(noise_key, (batch, latent_size), dtype=jnp.float32)
    z_ref = mu_ref + jnp.exp(0.5 * logvar_ref) * eps_ref

    assert jnp.allclose(mu, mu_ref)
    assert jnp.allclose(logvar, logvar_ref)
    assert jnp.allclose(z, z_ref, atol=1e-5, rtol=1e-5)

    # Eval-mode path: z == mu.
    z_eval, _ = diagonal_gaussian_forward(
        x, noise_key, latent_size, training=False)
    assert jnp.allclose(z_eval, mu_ref)

    print("KERNEL_OK")
</pallas_src>

<mosaic_0001>
module attributes {stable_mosaic.version = 11 : i64} {
  func.func @_diag_gaussian_kernel(%arg0: i32, %arg1: memref<8x128xf32, #tpu.memory_space<vmem>>, %arg2: memref<8x128xf32, #tpu.memory_space<vmem>>, %arg3: memref<8x128xf32, #tpu.memory_space<vmem>>, %arg4: memref<8x128xf32, #tpu.memory_space<vmem>>) attributes {dimension_semantics = [#tpu.dimension_semantics<parallel>], iteration_bounds = array<i64: 1>, scalar_prefetch = 0 : i64, scratch_operands = 0 : i64, tpu.core_type = #tpu.core_type<tc>, window_params = [{transform_indices = @transform_0, window_bounds = array<i64: 8, 128>}, {transform_indices = @transform_1, window_bounds = array<i64: 8, 128>}, {transform_indices = @transform_2, window_bounds = array<i64: 8, 128>}, {transform_indices = @transform_3, window_bounds = array<i64: 8, 128>}]} {
    %c0 = arith.constant 0 : index
    %c0_0 = arith.constant 0 : index
    %0 = vector.load %arg1[%c0, %c0_0] : memref<8x128xf32, #tpu.memory_space<vmem>>, vector<8x128xf32>
    %c0_1 = arith.constant 0 : index
    %c0_2 = arith.constant 0 : index
    %1 = vector.load %arg2[%c0_1, %c0_2] : memref<8x128xf32, #tpu.memory_space<vmem>>, vector<8x128xf32>
    %c0_3 = arith.constant 0 : index
    %c0_4 = arith.constant 0 : index
    %2 = vector.load %arg3[%c0_3, %c0_4] : memref<8x128xf32, #tpu.memory_space<vmem>>, vector<8x128xf32>
    %cst = arith.constant 5.000000e-01 : f32
    %3 = vector.broadcast %cst : f32 to vector<8x128xf32>
    %4 = arith.mulf %3, %1 : vector<8x128xf32>
    %5 = math.exp %4 : vector<8x128xf32>
    %6 = arith.mulf %5, %2 : vector<8x128xf32>
    %7 = arith.addf %0, %6 : vector<8x128xf32>
    %c0_5 = arith.constant 0 : index
    %c0_6 = arith.constant 0 : index
    %8 = vector.load %arg4[%c0_5, %c0_6] : memref<8x128xf32, #tpu.memory_space<vmem>>, vector<8x128xf32>
    tpu.vector_store %arg4[%c0_5, %c0_6], %7 {strides = array<i32>} : memref<8x128xf32, #tpu.memory_space<vmem>>, vector<8x128xf32>,
    return
  }
  func.func @transform_0(%arg0: i32) -> (i32, i32) {
    %c0_i32 = arith.constant 0 : i32
    %c0_i32_0 = arith.constant 0 : i32
    return %arg0, %c0_i32 : i32, i32
  }
  func.func @transform_1(%arg0: i32) -> (i32, i32) {
    %c1_i32 = arith.constant 1 : i32
    %c0_i32 = arith.constant 0 : i32
    return %arg0, %c1_i32 : i32, i32
  }
  func.func @transform_2(%arg0: i32) -> (i32, i32) {
    %c0_i32 = arith.constant 0 : i32
    %c0_i32_0 = arith.constant 0 : i32
    return %arg0, %c0_i32 : i32, i32
  }
  func.func @transform_3(%arg0: i32) -> (i32, i32) {
    %c0_i32 = arith.constant 0 : i32
    %c0_i32_0 = arith.constant 0 : i32
    return %arg0, %c0_i32 : i32, i32
  }
}

</mosaic_0001>

<bundles_post_ra>
// kernel: tpu_custom_call.1
= control target key start
LH: loop header
LB: loop body
LE: loop exit
PB: predicated region body
PF: predicated region fallthrough
CT: control target
= control target key end

     0   :  { %8 = vsyncpa [#allocation3], 0  ;;  %s251_s0 = inlined_call_operand.hbm [shape: f32[8,256], index: 0, kind: input, shape index: {}]   ;;  %s252_s1 = inlined_call_operand.hbm [shape: f32[8,256], index: 1, kind: input, shape index: {}]   ;;  %s253_s2 = inlined_call_operand.hbm [shape: f32[8,128], index: 2, kind: input, shape index: {}]   ;;  %s254_s3 = inlined_call_operand.hbm [shape: f32[8,128], index: 3, kind: output, shape index: {}]  }
   0x1   :  { %9 = vsyncpa [#allocation6], 0  ;;  %s26_s14 = scalar_lea.hbm %s252_s1, 128 }
   0x2   :  { %10 = vsyncpa [#allocation4], 0  ;;  %s179_s15 = smov [#allocation5]   ;;  %s180_s17 = smov [#allocation2]  }
   0x3   :  { %s28_s16 = sshll.u32 %s179_s15, 4  ;;  %s17_s18 = sshll.u32 %s180_s17, 4  ;;  %s29_s16 = int_to_ptr.vmem [resolvable:$true] %s28_s16  ;;  %s18_s18 = int_to_ptr.vmem [resolvable:$true] %s17_s18 }
   0x4   :  { %s106_s21 = scalar_lea.hbm %s252_s1, 256  ;;  %p85_p1 = scmp.lt.u32.totalorder %s26_s14, %s252_s1 }
   0x5   :  { %p83_p0 = scmp.ne.s32.totalorder %s26_s14, %s106_s21  ;;  %p86_p2 = scmp.lt.u32.totalorder %s106_s21, %s106_s21 }
   0x6   :  { %p88_p4 = scmp.lt.u32.totalorder %s106_s21, %s26_s14 }
   0x7   :  { %p87_p3 = por %p86_p2, %p85_p1 }
   0x9   :  { %p89_p5 = por %p88_p4, %p87_p3 }
   0xb   :  { %p90_p6 = pnand %p89_p5, %p83_p0 }
   0xd   :  { %93 = shalt.err (!%p90_p6)
}
   0xe   :  { %s94_s24 = scalar_lea.vmem %s29_s16, 128  ;;  %p99_p8 = scmp.lt.s32.totalorder %s29_s16, %s29_s16 }
   0xf   :  { %p95_p7 = scmp.ne.s32.totalorder %s29_s16, %s94_s24  ;;  %p100_p9 = scmp.lt.s32.totalorder %s94_s24, %s94_s24 }
  0x11   :  { %p101_p10 = por %p100_p9, %p99_p8 }
  0x13   :  { %p102_p11 = pnand %p101_p10, %p95_p7 }
  0x15   :  { %105 = shalt.err (!%p102_p11)
}
  0x16   :  { %31 = dma.hbm_to_vmem [thread:$0]  %s26_s14, 128, %s29_s16, [#allocation6]  }
  0x17   :  { %s107_s27 = scalar_lea.hbm %s251_s0, 128  ;;  %s109_s4 = scalar_lea.hbm %s251_s0, 256 }
  0x18   :  { %p108_p12 = scmp.ne.s32.totalorder %s251_s0, %s107_s27  ;;  %p110_p13 = scmp.lt.u32.totalorder %s109_s4, %s107_s27 }
  0x19   :  { %p111_p0 = scmp.lt.u32.totalorder %s107_s27, %s251_s0 }
  0x1b   :  { %p112_p1 = por %p111_p0, %p110_p13 }
  0x1d   :  { %p113_p2 = pnand %p112_p1, %p108_p12 }
  0x1f   :  { %116 = shalt.err (!%p113_p2)
}
  0x20   :  { %s117_s7 = scalar_lea.vmem %s18_s18, 128  ;;  %p122_p4 = scmp.lt.s32.totalorder %s18_s18, %s18_s18 }
  0x21   :  { %p118_p3 = scmp.ne.s32.totalorder %s18_s18, %s117_s7  ;;  %p123_p5 = scmp.lt.s32.totalorder %s117_s7, %s117_s7 }
  0x23   :  { %p124_p6 = por %p123_p5, %p122_p4 }
  0x25   :  { %p125_p7 = pnand %p124_p6, %p118_p3 }
  0x27   :  { %128 = shalt.err (!%p125_p7)
}
  0x28   :  { %20 = dma.hbm_to_vmem [thread:$0]  %s251_s0, 128, %s18_s18, [#allocation3]  }
  0x29   :  { %s181_s10 = smov [#allocation7]   ;;  %s129_s14 = scalar_lea.hbm %s253_s2, 128 }
  0x2a   :  { %s38_s11 = sshll.u32 %s181_s10, 4  ;;  %p130_p8 = scmp.ne.s32.totalorder %s253_s2, %s129_s14  ;;  %s39_s11 = int_to_ptr.vmem [resolvable:$true] %s38_s11 }
  0x2b   :  { %p133_p9 = scmp.lt.u32.totalorder %s129_s14, %s253_s2 }
  0x2d   :  { %p135_p10 = pnand %p133_p9, %p130_p8 }
  0x2f   :  { %138 = shalt.err (!%p135_p10)
}
  0x30   :  { %s139_s20 = scalar_lea.vmem %s39_s11, 128  ;;  %p144_p12 = scmp.lt.s32.totalorder %s39_s11, %s39_s11 }
  0x31   :  { %p140_p11 = scmp.ne.s32.totalorder %s39_s11, %s139_s20  ;;  %p145_p13 = scmp.lt.s32.totalorder %s139_s20, %s139_s20 }
  0x33   :  { %p146_p0 = por %p145_p13, %p144_p12 }
  0x35   :  { %p147_p1 = pnand %p146_p0, %p140_p11 }
  0x37   :  { %150 = shalt.err (!%p147_p1)
}
  0x38   :  { %41 = dma.hbm_to_vmem [thread:$0]  %s253_s2, 128, %s39_s11, [#allocation6]  }
  0x39   :  { %173 = dma.done.wait [#allocation3], 128  }
  0x3a   :  { %174 = vsyncadd [#allocation3], 4294967168 }
  0x3b   :  { %175 = dma.done.wait [#allocation6], 256  }
  0x3c   :  { %176 = vsyncadd [#allocation6], 4294967040  ;;  %v52_v0 = vld [vmem:[#allocation5] sm:$0xff]  ;;  %v53_v3 = vld [vmem:[#allocation7] sm:$0xff]  ;;  %s182_s21 = smov [#allocation8]  }
  0x3d   :  { %v54_v1 = vmul.f32 0.5, %v52_v0  ;;  %v51_v5 = vld [vmem:[#allocation2] sm:$0xff]  ;;  %s66_s22 = sshll.u32 %s182_s21, 4  ;;  %s67_s22 = int_to_ptr.vmem [resolvable:$true] %s66_s22 }
  0x3e   :  { %s151_s23 = scalar_lea.vmem %s67_s22, 128  ;;  %p156_p3 = scmp.lt.s32.totalorder %s67_s22, %s67_s22 }
  0x3f   :  { %v55_v2 = vmul.f32 1.442695, %v54_v1  ;;  %p152_p2 = scmp.ne.s32.totalorder %s67_s22, %s151_s23  ;;  %p157_p4 = scmp.lt.s32.totalorder %s151_s23, %s151_s23 }
  0x41   :  { %80 = vpow2.f32 %v55_v2  ;;  %p158_p5 = por %p157_p4, %p156_p3 }
  0x43   :  { %p159_p6 = pnand %p158_p5, %p152_p2 }
  0x4b   :  { %v81_v4 = vpop.eup %80 }
  0x4c   :  { %v57_v6 = vmul.f32 %v81_v4, %v53_v3 }
  0x4e   :  { %v58_v7 = vadd.f32 %v57_v6, %v51_v5 }
  0x50   :  { %59 = vst [vmem:[#allocation8] sm:$0xff] %v58_v7 }
  0x51   :  { %162 = shalt.err (!%p159_p6)
}
  0x52   :  { %s163_s25 = scalar_lea.hbm %s254_s3, 128 }
  0x53   :  { %p164_p7 = scmp.ne.s32.totalorder %s254_s3, %s163_s25  ;;  %p167_p8 = scmp.lt.u32.totalorder %s163_s25, %s254_s3 }
  0x55   :  { %p169_p9 = pnand %p167_p8, %p164_p7 }
  0x57   :  { %172 = shalt.err (!%p169_p9)
}
  0x58   :  { %69 = dma.vmem_to_hbm [thread:$0]  %s67_s22, 128, %s254_s3, [#allocation4]  }
  0x59   :  { %177 = dma.done.wait [#allocation4], 128  }
  0x5a   :  { %178 = vsyncadd [#allocation4], 4294967168 }
  0x5b   :  { %73 = vsyncpa [#allocation3], 1 }
  0x5c   :  { %74 = vsyncpa [#allocation6], 1 }
  0x5d   :  { %75 = vsyncpa [#allocation4], 1 }

</bundles_post_ra>
